<compile_context>
chip_gen: v5e
topology: v5e:2x2
jax: 0.10.0
libtpu: 0.0.40
codegen_flags: <defaults>
</compile_context>

<pallas_src>
import functools

import jax
import jax.numpy as jnp
from jax.experimental import pallas as pl
from jax.experimental.pallas import tpu as pltpu


def _choose_tile_i(L, d_k, a_bytes_per_el, budget_bytes=6 * 1024 * 1024):
    """Largest i-tile (multiple of 8 that divides L, <=512) whose a_k slab fits
    `budget_bytes` -- keeps double-buffered tiles comfortably under the 32 MiB
    default scoped VMEM limit on every TPU generation (incl. v7x)."""
    if L <= 8:
        return L
    max_ti = budget_bytes // max(1, d_k * L * a_bytes_per_el)
    max_ti = int(min(max(max_ti, 8), 512, L))
    for t in range(max_ti, 7, -1):
        if t % 8 == 0 and L % t == 0:
            return t
    return L  # fallback: single tile


def _rel_attn_kernel(qt_ref, k_ref, v_ref, a_ref, out_ref, attn_ref, *,
                     temperature, d_k):
    # qt_ref: (1, d_k, L)   k_ref: (1, TI, d_k)   v_ref: (1, L, d_v)
    # a_ref:  (d_k, TI, L)  out_ref: (1, TI, d_v) attn_ref: (1, TI, L)
    q_t = qt_ref[0].astype(jnp.float32)            # (d_k, L), lane-dense rows
    k = k_ref[0].astype(jnp.float32)               # (TI, d_k)

    TI = k_ref.shape[1]
    L = qt_ref.shape[2]

    # attn[i, j] = sum_d k[i, d] * q[j, d] * a_k[i, j, d]
    # accumulated as d_k full-width (TI, L) FMAs (no (TI, L, d_k) intermediate,
    # no lane-axis reduce).  d_k is small and static -> unroll at trace time.
    acc = jnp.zeros((TI, L), jnp.float32)
    for d in range(d_k):
        a_d = a_ref[d].astype(jnp.float32)         # (TI, L)
        q_row = q_t[d][None, :]                    # (1, L)  sublane broadcast
        k_col = k[:, d][:, None]                   # (TI, 1) per-row scale
        acc = acc + (a_d * q_row) * k_col

    logits = acc * (1.0 / temperature)
    m = jnp.max(logits, axis=-1, keepdims=True)
    e = jnp.exp(logits - m)
    denom = jnp.sum(e, axis=-1, keepdims=True)
    attn_sm = e * pl.reciprocal(denom, approx=True)    # EUP reciprocal

    attn_ref[0] = attn_sm.astype(attn_ref.dtype)
    # PV matmul on the MXU: bf16 inputs, f32 accumulation.
    out = jnp.dot(attn_sm.astype(jnp.bfloat16),
                  v_ref[0].astype(jnp.bfloat16),
                  preferred_element_type=jnp.float32)
    out_ref[0] = out.astype(out_ref.dtype)


def relative_scaled_dot_product_attention(q, k, v, a_k, d_k, d_v, n_head,
                                          temperature, mask=None,
                                          a_dtype=jnp.bfloat16):
    """q: (B, Lq, n_head*d_k), k: (B, Lk, n_head*d_k), v: (B, Lv, n_head*d_v),
    a_k: (Lq, Lq, d_k).  Returns (output (B,H,L,d_v), attn (B,H,L,L))."""
    assert mask is None  # TODO(synk): masked_fill path not implemented
    sz_b, len_q = q.shape[0], q.shape[1]
    len_k, len_v = k.shape[1], v.shape[1]
    assert len_k == len_q and len_v == len_q, "kernel assumes Lq == Lk == Lv"
    assert a_k.shape == (len_q, len_q, d_k), "a_k must be (Lq, Lq, d_k)"
    L = len_q
    BH = sz_b * n_head

    # Head split / flatten (B, H).  These are O(B*L*H*d) in HBM -- small next to
    # the a_k / attn streams.  q is laid out (d_k, L) per head so each q_t[d]
    # row is lane-dense inside the kernel (no per-step transpose).
    r_q_t = q.reshape(sz_b, L, n_head, d_k).transpose(0, 2, 3, 1).reshape(BH, d_k, L)
    r_k = k.reshape(sz_b, L, n_head, d_k).transpose(0, 2, 1, 3).reshape(BH, L, d_k)
    r_v = v.reshape(sz_b, L, n_head, d_v).transpose(0, 2, 1, 3).reshape(BH, L, d_v)
    # a_k pre-transposed to (d_k, L, L): each a_t[d] is a lane-dense (L, L)
    # plane; stored bf16 in HBM to halve the dominant HBM stream.
    a_t = jnp.transpose(a_k, (2, 0, 1)).astype(a_dtype)

    tile_i = _choose_tile_i(L, d_k, jnp.dtype(a_dtype).itemsize)
    n_it = L // tile_i

    kernel = functools.partial(_rel_attn_kernel,
                               temperature=float(temperature), d_k=int(d_k))

    out, attn = pl.pallas_call(
        kernel,
        out_shape=(
            jax.ShapeDtypeStruct((BH, L, d_v), jnp.float32),
            jax.ShapeDtypeStruct((BH, L, L), jnp.float32),
        ),
        grid_spec=pltpu.PrefetchScalarGridSpec(
            num_scalar_prefetch=0,
            # i-tiles outer, flattened (B*H) inner: the a_k block index is
            # constant along the inner axis, so each a_k tile is DMA'd once per
            # i-tile rather than once per (b, h).
            grid=(n_it, BH),
            in_specs=[
                pl.BlockSpec((1, d_k, L), lambda it, bh: (bh, 0, 0)),       # q^T
                pl.BlockSpec((1, tile_i, d_k), lambda it, bh: (bh, it, 0)),  # k
                pl.BlockSpec((1, L, d_v), lambda it, bh: (bh, 0, 0)),        # v
                pl.BlockSpec((d_k, tile_i, L), lambda it, bh: (0, it, 0)),   # a_k^T
            ],
            out_specs=[
                pl.BlockSpec((1, tile_i, d_v), lambda it, bh: (bh, it, 0)),
                pl.BlockSpec((1, tile_i, L), lambda it, bh: (bh, it, 0)),
            ],
        ),
        compiler_params=pltpu.CompilerParams(
            dimension_semantics=("parallel", "parallel")),
    )(r_q_t, r_k, r_v, a_t)

    # free reshapes back to the module's (B, H, L, d) / (B, H, L, L) layout
    return (out.reshape(sz_b, n_head, L, d_v),
            attn.reshape(sz_b, n_head, L, L))


def _reference(q, k, v, a_k, d_k, d_v, n_head, temperature):
    sz_b, len_q = q.shape[0], q.shape[1]
    len_v = v.shape[1]
    r_q1 = q.reshape(sz_b, len_q, n_head, d_k).transpose(0, 2, 1, 3)
    r_k1 = k.reshape(sz_b, len_q, n_head, d_k).transpose(0, 2, 1, 3)
    r_v1 = v.reshape(sz_b, len_v, n_head, d_v).transpose(0, 2, 1, 3)
    attn1 = r_q1[:, :, None, :, :] * r_k1[:, :, :, None, :]   # (B,H,Lk,Lq,d_k)
    attn = jnp.sum(attn1 * a_k, -1) / temperature
    attn = jax.nn.softmax(attn, axis=-1)
    out = jnp.matmul(attn, r_v1)
    return out, attn


if __name__ == "__main__":
    key = jax.random.PRNGKey(0)
    B, n_head, L, d_k, d_v = 2, 2, 8, 16, 16
    temperature = float(d_k) ** 0.5

    kq, kk, kv, ka = jax.random.split(key, 4)
    q = jax.random.normal(kq, (B, L, n_head * d_k), dtype=jnp.float32)
    k = jax.random.normal(kk, (B, L, n_head * d_k), dtype=jnp.float32)
    v = jax.random.normal(kv, (B, L, n_head * d_v), dtype=jnp.float32)
    # deterministic "relative position" tensor a_k (synthetic parameter)
    a_k = 0.1 * jax.random.normal(ka, (L, L, d_k), dtype=jnp.float32)

    out, attn = relative_scaled_dot_product_attention(
        q, k, v, a_k, d_k, d_v, n_head, temperature)
    jax.block_until_ready((out, attn))

    out_ref, attn_ref = _reference(q, k, v, a_k, d_k, d_v, n_head, temperature)
    # bf16 a_k storage + bf16 MXU inputs (f32 accumulation) -> slightly looser
    # tolerance than the pure-f32 reference.
    assert jnp.allclose(attn, attn_ref, atol=1e-2, rtol=1e-2), (
        float(jnp.max(jnp.abs(attn - attn_ref))))
    assert jnp.allclose(out, out_ref, atol=2e-2, rtol=2e-2), (
        float(jnp.max(jnp.abs(out - out_ref))))
    print("KERNEL_OK")
</pallas_src>

<mosaic_0001>
module attributes {stable_mosaic.version = 11 : i64} {
  func.func @_rel_attn_kernel(%arg0: i32, %arg1: i32, %arg2: memref<1x16x8xf32, #tpu.memory_space<vmem>>, %arg3: memref<1x8x16xf32, #tpu.memory_space<vmem>>, %arg4: memref<1x8x16xf32, #tpu.memory_space<vmem>>, %arg5: memref<16x8x8xbf16, #tpu.memory_space<vmem>>, %arg6: memref<1x8x16xf32, #tpu.memory_space<vmem>>, %arg7: memref<1x8x8xf32, #tpu.memory_space<vmem>>) attributes {dimension_semantics = [#tpu.dimension_semantics<parallel>, #tpu.dimension_semantics<parallel>], iteration_bounds = array<i64: 1, 4>, scalar_prefetch = 0 : i64, scratch_operands = 0 : i64, tpu.core_type = #tpu.core_type<tc>, window_params = [{transform_indices = @transform_0, window_bounds = array<i64: 1, 16, 8>}, {transform_indices = @transform_1, window_bounds = array<i64: 1, 8, 16>}, {transform_indices = @transform_2, window_bounds = array<i64: 1, 8, 16>}, {transform_indices = @transform_3, window_bounds = array<i64: 16, 8, 8>}, {transform_indices = @transform_4, window_bounds = array<i64: 1, 8, 16>}, {transform_indices = @transform_5, window_bounds = array<i64: 1, 8, 8>}]} {
    %c0 = arith.constant 0 : index
    %c0_0 = arith.constant 0 : index
    %c0_1 = arith.constant 0 : index
    %0 = vector.load %arg2[%c0, %c0_0, %c0_1] : memref<1x16x8xf32, #tpu.memory_space<vmem>>, vector<1x16x8xf32>
    %1 = vector.shape_cast %0 : vector<1x16x8xf32> to vector<16x8xf32>
    %c0_2 = arith.constant 0 : index
    %c0_3 = arith.constant 0 : index
    %c0_4 = arith.constant 0 : index
    %2 = vector.load %arg3[%c0_2, %c0_3, %c0_4] : memref<1x8x16xf32, #tpu.memory_space<vmem>>, vector<1x8x16xf32>
    %3 = vector.shape_cast %2 : vector<1x8x16xf32> to vector<8x16xf32>
    %cst = arith.constant 0.000000e+00 : f32
    %4 = vector.broadcast %cst : f32 to vector<8x8xf32>
    %c0_5 = arith.constant 0 : index
    %c0_6 = arith.constant 0 : index
    %c0_7 = arith.constant 0 : index
    %5 = vector.load %arg5[%c0_5, %c0_6, %c0_7] : memref<16x8x8xbf16, #tpu.memory_space<vmem>>, vector<1x8x8xbf16>
    %6 = vector.shape_cast %5 : vector<1x8x8xbf16> to vector<8x8xbf16>
    %7 = arith.extf %6 : vector<8x8xbf16> to vector<8x8xf32>
    %8 = vector.extract_strided_slice %1 {offsets = [0, 0], sizes = [1, 8], strides = [1, 1]} : vector<16x8xf32> to vector<1x8xf32>
    %9 = vector.shape_cast %8 : vector<1x8xf32> to vector<8xf32>
    %10 = vector.shape_cast %9 : vector<8xf32> to vector<1x8xf32>
    %11 = vector.extract_strided_slice %3 {offsets = [0, 0], sizes = [8, 1], strides = [1, 1]} : vector<8x16xf32> to vector<8x1xf32>
    %12 = vector.shape_cast %11 : vector<8x1xf32> to vector<8xf32>
    %13 = vector.shape_cast %12 : vector<8xf32> to vector<8x1xf32>
    %14 = vector.broadcast %10 : vector<1x8xf32> to vector<8x8xf32>
    %15 = arith.mulf %7, %14 : vector<8x8xf32>
    %16 = vector.broadcast %13 : vector<8x1xf32> to vector<8x8xf32>
    %17 = arith.mulf %15, %16 : vector<8x8xf32>
    %18 = arith.addf %4, %17 : vector<8x8xf32>
    %c1 = arith.constant 1 : index
    %c0_8 = arith.constant 0 : index
    %c0_9 = arith.constant 0 : index
    %19 = vector.load %arg5[%c1, %c0_8, %c0_9] : memref<16x8x8xbf16, #tpu.memory_space<vmem>>, vector<1x8x8xbf16>
    %20 = vector.shape_cast %19 : vector<1x8x8xbf16> to vector<8x8xbf16>
    %21 = arith.extf %20 : vector<8x8xbf16> to vector<8x8xf32>
    %22 = vector.extract_strided_slice %1 {offsets = [1, 0], sizes = [1, 8], strides = [1, 1]} : vector<16x8xf32> to vector<1x8xf32>
    %23 = vector.shape_cast %22 : vector<1x8xf32> to vector<8xf32>
    %24 = vector.shape_cast %23 : vector<8xf32> to vector<1x8xf32>
    %25 = vector.extract_strided_slice %3 {offsets = [0, 1], sizes = [8, 1], strides = [1, 1]} : vector<8x16xf32> to vector<8x1xf32>
    %26 = vector.shape_cast %25 : vector<8x1xf32> to vector<8xf32>
    %27 = vector.shape_cast %26 : vector<8xf32> to vector<8x1xf32>
    %28 = vector.broadcast %24 : vector<1x8xf32> to vector<8x8xf32>
    %29 = arith.mulf %21, %28 : vector<8x8xf32>
    %30 = vector.broadcast %27 : vector<8x1xf32> to vector<8x8xf32>
    %31 = arith.mulf %29, %30 : vector<8x8xf32>
    %32 = arith.addf %18, %31 : vector<8x8xf32>
    %c2 = arith.constant 2 : index
    %c0_10 = arith.constant 0 : index
    %c0_11 = arith.constant 0 : index
    %33 = vector.load %arg5[%c2, %c0_10, %c0_11] : memref<16x8x8xbf16, #tpu.memory_space<vmem>>, vector<1x8x8xbf16>
    %34 = vector.shape_cast %33 : vector<1x8x8xbf16> to vector<8x8xbf16>
    %35 = arith.extf %34 : vector<8x8xbf16> to vector<8x8xf32>
    %36 = vector.extract_strided_slice %1 {offsets = [2, 0], sizes = [1, 8], strides = [1, 1]} : vector<16x8xf32> to vector<1x8xf32>
    %37 = vector.shape_cast %36 : vector<1x8xf32> to vector<8xf32>
    %38 = vector.shape_cast %37 : vector<8xf32> to vector<1x8xf32>
    %39 = vector.extract_strided_slice %3 {offsets = [0, 2], sizes = [8, 1], strides = [1, 1]} : vector<8x16xf32> to vector<8x1xf32>
    %40 = vector.shape_cast %39 : vector<8x1xf32> to vector<8xf32>
    %41 = vector.shape_cast %40 : vector<8xf32> to vector<8x1xf32>
    %42 = vector.broadcast %38 : vector<1x8xf32> to vector<8x8xf32>
    %43 = arith.mulf %35, %42 : vector<8x8xf32>
    %44 = vector.broadcast %41 : vector<8x1xf32> to vector<8x8xf32>
    %45 = arith.mulf %43, %44 : vector<8x8xf32>
    %46 = arith.addf %32, %45 : vector<8x8xf32>
    %c3 = arith.constant 3 : index
    %c0_12 = arith.constant 0 : index
    %c0_13 = arith.constant 0 : index
    %47 = vector.load %arg5[%c3, %c0_12, %c0_13] : memref<16x8x8xbf16, #tpu.memory_space<vmem>>, vector<1x8x8xbf16>
    %48 = vector.shape_cast %47 : vector<1x8x8xbf16> to vector<8x8xbf16>
    %49 = arith.extf %48 : vector<8x8xbf16> to vector<8x8xf32>
    %50 = vector.extract_strided_slice %1 {offsets = [3, 0], sizes = [1, 8], strides = [1, 1]} : vector<16x8xf32> to vector<1x8xf32>
    %51 = vector.shape_cast %50 : vector<1x8xf32> to vector<8xf32>
    %52 = vector.shape_cast %51 : vector<8xf32> to vector<1x8xf32>
    %53 = vector.extract_strided_slice %3 {offsets = [0, 3], sizes = [8, 1], strides = [1, 1]} : vector<8x16xf32> to vector<8x1xf32>
    %54 = vector.shape_cast %53 : vector<8x1xf32> to vector<8xf32>
    %55 = vector.shape_cast %54 : vector<8xf32> to vector<8x1xf32>
    %56 = vector.broadcast %52 : vector<1x8xf32> to vector<8x8xf32>
    %57 = arith.mulf %49, %56 : vector<8x8xf32>
    %58 = vector.broadcast %55 : vector<8x1xf32> to vector<8x8xf32>
    %59 = arith.mulf %57, %58 : vector<8x8xf32>
    %60 = arith.addf %46, %59 : vector<8x8xf32>
    %c4 = arith.constant 4 : index
    %c0_14 = arith.constant 0 : index
    %c0_15 = arith.constant 0 : index
    %61 = vector.load %arg5[%c4, %c0_14, %c0_15] : memref<16x8x8xbf16, #tpu.memory_space<vmem>>, vector<1x8x8xbf16>
    %62 = vector.shape_cast %61 : vector<1x8x8xbf16> to vector<8x8xbf16>
    %63 = arith.extf %62 : vector<8x8xbf16> to vector<8x8xf32>
    %64 = vector.extract_strided_slice %1 {offsets = [4, 0], sizes = [1, 8], strides = [1, 1]} : vector<16x8xf32> to vector<1x8xf32>
    %65 = vector.shape_cast %64 : vector<1x8xf32> to vector<8xf32>
    %66 = vector.shape_cast %65 : vector<8xf32> to vector<1x8xf32>
    %67 = vector.extract_strided_slice %3 {offsets = [0, 4], sizes = [8, 1], strides = [1, 1]} : vector<8x16xf32> to vector<8x1xf32>
    %68 = vector.shape_cast %67 : vector<8x1xf32> to vector<8xf32>
    %69 = vector.shape_cast %68 : vector<8xf32> to vector<8x1xf32>
    %70 = vector.broadcast %66 : vector<1x8xf32> to vector<8x8xf32>
    %71 = arith.mulf %63, %70 : vector<8x8xf32>
    %72 = vector.broadcast %69 : vector<8x1xf32> to vector<8x8xf32>
    %73 = arith.mulf %71, %72 : vector<8x8xf32>
    %74 = arith.addf %60, %73 : vector<8x8xf32>
    %c5 = arith.constant 5 : index
    %c0_16 = arith.constant 0 : index
    %c0_17 = arith.constant 0 : index
    %75 = vector.load %arg5[%c5, %c0_16, %c0_17] : memref<16x8x8xbf16, #tpu.memory_space<vmem>>, vector<1x8x8xbf16>
    %76 = vector.shape_cast %75 : vector<1x8x8xbf16> to vector<8x8xbf16>
    %77 = arith.extf %76 : vector<8x8xbf16> to vector<8x8xf32>
    %78 = vector.extract_strided_slice %1 {offsets = [5, 0], sizes = [1, 8], strides = [1, 1]} : vector<16x8xf32> to vector<1x8xf32>
    %79 = vector.shape_cast %78 : vector<1x8xf32> to vector<8xf32>
    %80 = vector.shape_cast %79 : vector<8xf32> to vector<1x8xf32>
    %81 = vector.extract_strided_slice %3 {offsets = [0, 5], sizes = [8, 1], strides = [1, 1]} : vector<8x16xf32> to vector<8x1xf32>
    %82 = vector.shape_cast %81 : vector<8x1xf32> to vector<8xf32>
    %83 = vector.shape_cast %82 : vector<8xf32> to vector<8x1xf32>
    %84 = vector.broadcast %80 : vector<1x8xf32> to vector<8x8xf32>
    %85 = arith.mulf %77, %84 : vector<8x8xf32>
    %86 = vector.broadcast %83 : vector<8x1xf32> to vector<8x8xf32>
    %87 = arith.mulf %85, %86 : vector<8x8xf32>
    %88 = arith.addf %74, %87 : vector<8x8xf32>
    %c6 = arith.constant 6 : index
    %c0_18 = arith.constant 0 : index
    %c0_19 = arith.constant 0 : index
    %89 = vector.load %arg5[%c6, %c0_18, %c0_19] : memref<16x8x8xbf16, #tpu.memory_space<vmem>>, vector<1x8x8xbf16>
    %90 = vector.shape_cast %89 : vector<1x8x8xbf16> to vector<8x8xbf16>
    %91 = arith.extf %90 : vector<8x8xbf16> to vector<8x8xf32>
    %92 = vector.extract_strided_slice %1 {offsets = [6, 0], sizes = [1, 8], strides = [1, 1]} : vector<16x8xf32> to vector<1x8xf32>
    %93 = vector.shape_cast %92 : vector<1x8xf32> to vector<8xf32>
    %94 = vector.shape_cast %93 : vector<8xf32> to vector<1x8xf32>
    %95 = vector.extract_strided_slice %3 {offsets = [0, 6], sizes = [8, 1], strides = [1, 1]} : vector<8x16xf32> to vector<8x1xf32>
    %96 = vector.shape_cast %95 : vector<8x1xf32> to vector<8xf32>
    %97 = vector.shape_cast %96 : vector<8xf32> to vector<8x1xf32>
    %98 = vector.broadcast %94 : vector<1x8xf32> to vector<8x8xf32>
    %99 = arith.mulf %91, %98 : vector<8x8xf32>
    %100 = vector.broadcast %97 : vector<8x1xf32> to vector<8x8xf32>
    %101 = arith.mulf %99, %100 : vector<8x8xf32>
    %102 = arith.addf %88, %101 : vector<8x8xf32>
    %c7 = arith.constant 7 : index
    %c0_20 = arith.constant 0 : index
    %c0_21 = arith.constant 0 : index
    %103 = vector.load %arg5[%c7, %c0_20, %c0_21] : memref<16x8x8xbf16, #tpu.memory_space<vmem>>, vector<1x8x8xbf16>
    %104 = vector.shape_cast %103 : vector<1x8x8xbf16> to vector<8x8xbf16>
    %105 = arith.extf %104 : vector<8x8xbf16> to vector<8x8xf32>
    %106 = vector.extract_strided_slice %1 {offsets = [7, 0], sizes = [1, 8], strides = [1, 1]} : vector<16x8xf32> to vector<1x8xf32>
    %107 = vector.shape_cast %106 : vector<1x8xf32> to vector<8xf32>
    %108 = vector.shape_cast %107 : vector<8xf32> to vector<1x8xf32>
    %109 = vector.extract_strided_slice %3 {offsets = [0, 7], sizes = [8, 1], strides = [1, 1]} : vector<8x16xf32> to vector<8x1xf32>
    %110 = vector.shape_cast %109 : vector<8x1xf32> to vector<8xf32>
    %111 = vector.shape_cast %110 : vector<8xf32> to vector<8x1xf32>
    %112 = vector.broadcast %108 : vector<1x8xf32> to vector<8x8xf32>
    %113 = arith.mulf %105, %112 : vector<8x8xf32>
    %114 = vector.broadcast %111 : vector<8x1xf32> to vector<8x8xf32>
    %115 = arith.mulf %113, %114 : vector<8x8xf32>
    %116 = arith.addf %102, %115 : vector<8x8xf32>
    %c8 = arith.constant 8 : index
    %c0_22 = arith.constant 0 : index
    %c0_23 = arith.constant 0 : index
    %117 = vector.load %arg5[%c8, %c0_22, %c0_23] : memref<16x8x8xbf16, #tpu.memory_space<vmem>>, vector<1x8x8xbf16>
    %118 = vector.shape_cast %117 : vector<1x8x8xbf16> to vector<8x8xbf16>
    %119 = arith.extf %118 : vector<8x8xbf16> to vector<8x8xf32>
    %120 = vector.extract_strided_slice %1 {offsets = [8, 0], sizes = [1, 8], strides = [1, 1]} : vector<16x8xf32> to vector<1x8xf32>
    %121 = vector.shape_cast %120 : vector<1x8xf32> to vector<8xf32>
    %122 = vector.shape_cast %121 : vector<8xf32> to vector<1x8xf32>
    %123 = vector.extract_strided_slice %3 {offsets = [0, 8], sizes = [8, 1], strides = [1, 1]} : vector<8x16xf32> to vector<8x1xf32>
    %124 = vector.shape_cast %123 : vector<8x1xf32> to vector<8xf32>
    %125 = vector.shape_cast %124 : vector<8xf32> to vector<8x1xf32>
    %126 = vector.broadcast %122 : vector<1x8xf32> to vector<8x8xf32>
    %127 = arith.mulf %119, %126 : vector<8x8xf32>
    %128 = vector.broadcast %125 : vector<8x1xf32> to vector<8x8xf32>
    %129 = arith.mulf %127, %128 : vector<8x8xf32>
    %130 = arith.addf %116, %129 : vector<8x8xf32>
    %c9 = arith.constant 9 : index
    %c0_24 = arith.constant 0 : index
    %c0_25 = arith.constant 0 : index
    %131 = vector.load %arg5[%c9, %c0_24, %c0_25] : memref<16x8x8xbf16, #tpu.memory_space<vmem>>, vector<1x8x8xbf16>
    %132 = vector.shape_cast %131 : vector<1x8x8xbf16> to vector<8x8xbf16>
    %133 = arith.extf %132 : vector<8x8xbf16> to vector<8x8xf32>
    %134 = vector.extract_strided_slice %1 {offsets = [9, 0], sizes = [1, 8], strides = [1, 1]} : vector<16x8xf32> to vector<1x8xf32>
    %135 = vector.shape_cast %134 : vector<1x8xf32> to vector<8xf32>
    %136 = vector.shape_cast %135 : vector<8xf32> to vector<1x8xf32>
    %137 = vector.extract_strided_slice %3 {offsets = [0, 9], sizes = [8, 1], strides = [1, 1]} : vector<8x16xf32> to vector<8x1xf32>
    %138 = vector.shape_cast %137 : vector<8x1xf32> to vector<8xf32>
    %139 = vector.shape_cast %138 : vector<8xf32> to vector<8x1xf32>
    %140 = vector.broadcast %136 : vector<1x8xf32> to vector<8x8xf32>
    %141 = arith.mulf %133, %140 : vector<8x8xf32>
    %142 = vector.broadcast %139 : vector<8x1xf32> to vector<8x8xf32>
    %143 = arith.mulf %141, %142 : vector<8x8xf32>
    %144 = arith.addf %130, %143 : vector<8x8xf32>
    %c10 = arith.constant 10 : index
    %c0_26 = arith.constant 0 : index
    %c0_27 = arith.constant 0 : index
    %145 = vector.load %arg5[%c10, %c0_26, %c0_27] : memref<16x8x8xbf16, #tpu.memory_space<vmem>>, vector<1x8x8xbf16>
    %146 = vector.shape_cast %145 : vector<1x8x8xbf16> to vector<8x8xbf16>
    %147 = arith.extf %146 : vector<8x8xbf16> to vector<8x8xf32>
    %148 = vector.extract_strided_slice %1 {offsets = [10, 0], sizes = [1, 8], strides = [1, 1]} : vector<16x8xf32> to vector<1x8xf32>
    %149 = vector.shape_cast %148 : vector<1x8xf32> to vector<8xf32>
    %150 = vector.shape_cast %149 : vector<8xf32> to vector<1x8xf32>
    %151 = vector.extract_strided_slice %3 {offsets = [0, 10], sizes = [8, 1], strides = [1, 1]} : vector<8x16xf32> to vector<8x1xf32>
    %152 = vector.shape_cast %151 : vector<8x1xf32> to vector<8xf32>
    %153 = vector.shape_cast %152 : vector<8xf32> to vector<8x1xf32>
    %154 = vector.broadcast %150 : vector<1x8xf32> to vector<8x8xf32>
    %155 = arith.mulf %147, %154 : vector<8x8xf32>
    %156 = vector.broadcast %153 : vector<8x1xf32> to vector<8x8xf32>
    %157 = arith.mulf %155, %156 : vector<8x8xf32>
    %158 = arith.addf %144, %157 : vector<8x8xf32>
    %c11 = arith.constant 11 : index
    %c0_28 = arith.constant 0 : index
    %c0_29 = arith.constant 0 : index
    %159 = vector.load %arg5[%c11, %c0_28, %c0_29] : memref<16x8x8xbf16, #tpu.memory_space<vmem>>, vector<1x8x8xbf16>
    %160 = vector.shape_cast %159 : vector<1x8x8xbf16> to vector<8x8xbf16>
    %161 = arith.extf %160 : vector<8x8xbf16> to vector<8x8xf32>
    %162 = vector.extract_strided_slice %1 {offsets = [11, 0], sizes = [1, 8], strides = [1, 1]} : vector<16x8xf32> to vector<1x8xf32>
    %163 = vector.shape_cast %162 : vector<1x8xf32> to vector<8xf32>
    %164 = vector.shape_cast %163 : vector<8xf32> to vector<1x8xf32>
    %165 = vector.extract_strided_slice %3 {offsets = [0, 11], sizes = [8, 1], strides = [1, 1]} : vector<8x16xf32> to vector<8x1xf32>
    %166 = vector.shape_cast %165 : vector<8x1xf32> to vector<8xf32>
    %167 = vector.shape_cast %166 : vector<8xf32> to vector<8x1xf32>
    %168 = vector.broadcast %164 : vector<1x8xf32> to vector<8x8xf32>
    %169 = arith.mulf %161, %168 : vector<8x8xf32>
    %170 = vector.broadcast %167 : vector<8x1xf32> to vector<8x8xf32>
    %171 = arith.mulf %169, %170 : vector<8x8xf32>
    %172 = arith.addf %158, %171 : vector<8x8xf32>
    %c12 = arith.constant 12 : index
    %c0_30 = arith.constant 0 : index
    %c0_31 = arith.constant 0 : index
    %173 = vector.load %arg5[%c12, %c0_30, %c0_31] : memref<16x8x8xbf16, #tpu.memory_space<vmem>>, vector<1x8x8xbf16>
    %174 = vector.shape_cast %173 : vector<1x8x8xbf16> to vector<8x8xbf16>
    %175 = arith.extf %174 : vector<8x8xbf16> to vector<8x8xf32>
    %176 = vector.extract_strided_slice %1 {offsets = [12, 0], sizes = [1, 8], strides = [1, 1]} : vector<16x8xf32> to vector<1x8xf32>
    %177 = vector.shape_cast %176 : vector<1x8xf32> to vector<8xf32>
    %178 = vector.shape_cast %177 : vector<8xf32> to vector<1x8xf32>
    %179 = vector.extract_strided_slice %3 {offsets = [0, 12], sizes = [8, 1], strides = [1, 1]} : vector<8x16xf32> to vector<8x1xf32>
    %180 = vector.shape_cast %179 : vector<8x1xf32> to vector<8xf32>
    %181 = vector.shape_cast %180 : vector<8xf32> to vector<8x1xf32>
    %182 = vector.broadcast %178 : vector<1x8xf32> to vector<8x8xf32>
    %183 = arith.mulf %175, %182 : vector<8x8xf32>
    %184 = vector.broadcast %181 : vector<8x1xf32> to vector<8x8xf32>
    %185 = arith.mulf %183, %184 : vector<8x8xf32>
    %186 = arith.addf %172, %185 : vector<8x8xf32>
    %c13 = arith.constant 13 : index
    %c0_32 = arith.constant 0 : index
    %c0_33 = arith.constant 0 : index
    %187 = vector.load %arg5[%c13, %c0_32, %c0_33] : memref<16x8x8xbf16, #tpu.memory_space<vmem>>, vector<1x8x8xbf16>
    %188 = vector.shape_cast %187 : vector<1x8x8xbf16> to vector<8x8xbf16>
    %189 = arith.extf %188 : vector<8x8xbf16> to vector<8x8xf32>
    %190 = vector.extract_strided_slice %1 {offsets = [13, 0], sizes = [1, 8], strides = [1, 1]} : vector<16x8xf32> to vector<1x8xf32>
    %191 = vector.shape_cast %190 : vector<1x8xf32> to vector<8xf32>
    %192 = vector.shape_cast %191 : vector<8xf32> to vector<1x8xf32>
    %193 = vector.extract_strided_slice %3 {offsets = [0, 13], sizes = [8, 1], strides = [1, 1]} : vector<8x16xf32> to vector<8x1xf32>
    %194 = vector.shape_cast %193 : vector<8x1xf32> to vector<8xf32>
    %195 = vector.shape_cast %194 : vector<8xf32> to vector<8x1xf32>
    %196 = vector.broadcast %192 : vector<1x8xf32> to vector<8x8xf32>
    %197 = arith.mulf %189, %196 : vector<8x8xf32>
    %198 = vector.broadcast %195 : vector<8x1xf32> to vector<8x8xf32>
    %199 = arith.mulf %197, %198 : vector<8x8xf32>
    %200 = arith.addf %186, %199 : vector<8x8xf32>
    %c14 = arith.constant 14 : index
    %c0_34 = arith.constant 0 : index
    %c0_35 = arith.constant 0 : index
    %201 = vector.load %arg5[%c14, %c0_34, %c0_35] : memref<16x8x8xbf16, #tpu.memory_space<vmem>>, vector<1x8x8xbf16>
    %202 = vector.shape_cast %201 : vector<1x8x8xbf16> to vector<8x8xbf16>
    %203 = arith.extf %202 : vector<8x8xbf16> to vector<8x8xf32>
    %204 = vector.extract_strided_slice %1 {offsets = [14, 0], sizes = [1, 8], strides = [1, 1]} : vector<16x8xf32> to vector<1x8xf32>
    %205 = vector.shape_cast %204 : vector<1x8xf32> to vector<8xf32>
    %206 = vector.shape_cast %205 : vector<8xf32> to vector<1x8xf32>
    %207 = vector.extract_strided_slice %3 {offsets = [0, 14], sizes = [8, 1], strides = [1, 1]} : vector<8x16xf32> to vector<8x1xf32>
    %208 = vector.shape_cast %207 : vector<8x1xf32> to vector<8xf32>
    %209 = vector.shape_cast %208 : vector<8xf32> to vector<8x1xf32>
    %210 = vector.broadcast %206 : vector<1x8xf32> to vector<8x8xf32>
    %211 = arith.mulf %203, %210 : vector<8x8xf32>
    %212 = vector.broadcast %209 : vector<8x1xf32> to vector<8x8xf32>
    %213 = arith.mulf %211, %212 : vector<8x8xf32>
    %214 = arith.addf %200, %213 : vector<8x8xf32>
    %c15 = arith.constant 15 : index
    %c0_36 = arith.constant 0 : index
    %c0_37 = arith.constant 0 : index
    %215 = vector.load %arg5[%c15, %c0_36, %c0_37] : memref<16x8x8xbf16, #tpu.memory_space<vmem>>, vector<1x8x8xbf16>
    %216 = vector.shape_cast %215 : vector<1x8x8xbf16> to vector<8x8xbf16>
    %217 = arith.extf %216 : vector<8x8xbf16> to vector<8x8xf32>
    %218 = vector.extract_strided_slice %1 {offsets = [15, 0], sizes = [1, 8], strides = [1, 1]} : vector<16x8xf32> to vector<1x8xf32>
    %219 = vector.shape_cast %218 : vector<1x8xf32> to vector<8xf32>
    %220 = vector.shape_cast %219 : vector<8xf32> to vector<1x8xf32>
    %221 = vector.extract_strided_slice %3 {offsets = [0, 15], sizes = [8, 1], strides = [1, 1]} : vector<8x16xf32> to vector<8x1xf32>
    %222 = vector.shape_cast %221 : vector<8x1xf32> to vector<8xf32>
    %223 = vector.shape_cast %222 : vector<8xf32> to vector<8x1xf32>
    %224 = vector.broadcast %220 : vector<1x8xf32> to vector<8x8xf32>
    %225 = arith.mulf %217, %224 : vector<8x8xf32>
    %226 = vector.broadcast %223 : vector<8x1xf32> to vector<8x8xf32>
    %227 = arith.mulf %225, %226 : vector<8x8xf32>
    %228 = arith.addf %214, %227 : vector<8x8xf32>
    %cst_38 = arith.constant 2.500000e-01 : f32
    %229 = vector.broadcast %cst_38 : f32 to vector<8x8xf32>
    %230 = arith.mulf %228, %229 : vector<8x8xf32>
    %cst_39 = arith.constant dense<0xFF800000> : vector<8xf32>
    %231 = vector.multi_reduction <maximumf>, %230, %cst_39 [1] : vector<8x8xf32> to vector<8xf32>
    %232 = vector.shape_cast %231 : vector<8xf32> to vector<8x1xf32>
    %233 = vector.broadcast %232 : vector<8x1xf32> to vector<8x8xf32>
    %234 = arith.subf %230, %233 : vector<8x8xf32>
    %235 = math.exp %234 : vector<8x8xf32>
    %cst_40 = arith.constant dense<0.000000e+00> : vector<8xf32>
    %236 = vector.multi_reduction <add>, %235, %cst_40 [1] : vector<8x8xf32> to vector<8xf32>
    %237 = vector.shape_cast %236 : vector<8xf32> to vector<8x1xf32>
    %238 = tpu.reciprocal %237 {approx = true} : vector<8x1xf32> -> vector<8x1xf32>
    %239 = vector.broadcast %238 : vector<8x1xf32> to vector<8x8xf32>
    %240 = arith.mulf %235, %239 : vector<8x8xf32>
    %c0_41 = arith.constant 0 : index
    %c0_42 = arith.constant 0 : index
    %c0_43 = arith.constant 0 : index
    %241 = vector.load %arg7[%c0_41, %c0_42, %c0_43] : memref<1x8x8xf32, #tpu.memory_space<vmem>>, vector<1x8x8xf32>
    %242 = vector.shape_cast %241 : vector<1x8x8xf32> to vector<8x8xf32>
    %243 = vector.shape_cast %240 : vector<8x8xf32> to vector<1x8x8xf32>
    tpu.vector_store %arg7[%c0_41, %c0_42, %c0_43], %243 {strides = array<i32>} : memref<1x8x8xf32, #tpu.memory_space<vmem>>, vector<1x8x8xf32>,
    %244 = arith.truncf %240 : vector<8x8xf32> to vector<8x8xbf16>
    %c0_44 = arith.constant 0 : index
    %c0_45 = arith.constant 0 : index
    %c0_46 = arith.constant 0 : index
    %245 = vector.load %arg4[%c0_44, %c0_45, %c0_46] : memref<1x8x16xf32, #tpu.memory_space<vmem>>, vector<1x8x16xf32>
    %246 = vector.shape_cast %245 : vector<1x8x16xf32> to vector<8x16xf32>
    %247 = arith.truncf %246 : vector<8x16xf32> to vector<8x16xbf16>
    %cst_47 = arith.constant dense<0.000000e+00> : vector<8x16xf32>
    %248 = tpu.matmul %244, %247, %cst_47 {dimension_numbers = #tpu.dot_dimension_numbers<[1], [0], [0], [1], [0, 0, 1, 1], [], []>} : vector<8x8xbf16>, vector<8x16xbf16>, vector<8x16xf32> -> vector<8x16xf32>
    %c0_48 = arith.constant 0 : index
    %c0_49 = arith.constant 0 : index
    %c0_50 = arith.constant 0 : index
    %249 = vector.load %arg6[%c0_48, %c0_49, %c0_50] : memref<1x8x16xf32, #tpu.memory_space<vmem>>, vector<1x8x16xf32>
    %250 = vector.shape_cast %249 : vector<1x8x16xf32> to vector<8x16xf32>
    %251 = vector.shape_cast %248 : vector<8x16xf32> to vector<1x8x16xf32>
    tpu.vector_store %arg6[%c0_48, %c0_49, %c0_50], %251 {strides = array<i32>} : memref<1x8x16xf32, #tpu.memory_space<vmem>>, vector<1x8x16xf32>,
    return
  }
  func.func @transform_0(%arg0: i32, %arg1: i32) -> (i32, i32, i32) {
    %c0_i32 = arith.constant 0 : i32
    %c0_i32_0 = arith.constant 0 : i32
    %c0_i32_1 = arith.constant 0 : i32
    return %arg1, %c0_i32, %c0_i32_0 : i32, i32, i32
  }
  func.func @transform_1(%arg0: i32, %arg1: i32) -> (i32, i32, i32) {
    %c0_i32 = arith.constant 0 : i32
    %c0_i32_0 = arith.constant 0 : i32
    return %arg1, %arg0, %c0_i32 : i32, i32, i32
  }
  func.func @transform_2(%arg0: i32, %arg1: i32) -> (i32, i32, i32) {
    %c0_i32 = arith.constant 0 : i32
    %c0_i32_0 = arith.constant 0 : i32
    %c0_i32_1 = arith.constant 0 : i32
    return %arg1, %c0_i32, %c0_i32_0 : i32, i32, i32
  }
  func.func @transform_3(%arg0: i32, %arg1: i32) -> (i32, i32, i32) {
    %c0_i32 = arith.constant 0 : i32
    %c0_i32_0 = arith.constant 0 : i32
    %c0_i32_1 = arith.constant 0 : i32
    return %c0_i32, %arg0, %c0_i32_0 : i32, i32, i32
  }
  func.func @transform_4(%arg0: i32, %arg1: i32) -> (i32, i32, i32) {
    %c0_i32 = arith.constant 0 : i32
    %c0_i32_0 = arith.constant 0 : i32
    return %arg1, %arg0, %c0_i32 : i32, i32, i32
  }
  func.func @transform_5(%arg0: i32, %arg1: i32) -> (i32, i32, i32) {
    %c0_i32 = arith.constant 0 : i32
    %c0_i32_0 = arith.constant 0 : i32
    return %arg1, %arg0, %c0_i32 : i32, i32, i32
  }
}

</mosaic_0001>

<bundles_post_ra>
// kernel: tpu_custom_call.1
= control target key start
LH: loop header
LB: loop body
LE: loop exit
PB: predicated region body
PF: predicated region fallthrough
CT: control target
= control target key end

     0   :  { %s1163_s0 = inlined_call_operand.vmem [shape: f32[4,16,8], index: 0, kind: input, shape index: {}]   ;;  %s1164_s1 = inlined_call_operand.vmem [shape: f32[4,8,16], index: 1, kind: input, shape index: {}]   ;;  %s1165_s2 = inlined_call_operand.vmem [shape: f32[4,8,16], index: 2, kind: input, shape index: {}]   ;;  %s1166_s3 = inlined_call_operand.vmem [shape: bf16[16,8,8], index: 3, kind: input, shape index: {}]   ;;  %s1167_s4 = inlined_call_operand.hbm [shape: f32[4,8,16], index: 4, kind: output, shape index: {0}]   ;;  %s1168_s5 = inlined_call_operand.hbm [shape: f32[4,8,8], index: 5, kind: output, shape index: {1}]  }
   0x1   :  { %1169 = sst [smem:[#allocation8_spill]] %s1163_s0 }
   0x2   :  { %11 = vsyncpa [#allocation3], 0 }
   0x3   :  { %13 = vsyncpa [#allocation3 + $0x1], 0 }
   0x4   :  { %14 = vsyncpa [#allocation5], 0 }
   0x5   :  { %16 = vsyncpa [#allocation5 + $0x1], 0  ;;  %s1002_s18 = smov 0   ;;  %s1004_s19 = smov 0  }
   0x6   :  { %s1006_s20 = smov 0   ;;  %s1008_s21 = smov 0  }
   0x7   :  { %s1010_s22 = smov 0   ;;  %s1012_s23 = smov 0  }
   0x8 LB: > { %s712_s24 = sadd.s32 4294967295, %s954_s23   ;;  %s713_s25 = sadd.s32 4294967294, %s954_s23   ;;  %s954_s23 = sphi %s1012_s23, %s22_s23   ;;  %s950_s22 = sphi %s1010_s22, %s1177_s22   ;;  %s946_s21 = sphi %s1008_s21, %s1176_s21   ;;  %s942_s20 = sphi %s1006_s20, %s1175_s20   ;;  %s938_s19 = sphi %s1004_s19, %s1174_s19   ;;  %s934_s18 = sphi %s1002_s18, %s1173_s18  }
   0x9   : > { %s31_s26 = sadd.s32 1, %s950_s22  ;;  %s149_s27 = sadd.s32 1, %s942_s20 }
   0xa   : > { %p32_p0 = scmp.ge.s32.totalorder %s31_s26, 4  ;;  %p159_p1 = scmp.ne.s32.totalorder %s942_s20, %s938_s19 }
   0xb   : > { %p160_p2 = scmp.eq.s32.totalorder %s712_s24, 3  ;;  %p165_p3 = scmp.ne.s32.totalorder %s938_s19, %s934_s18 }
   0xc   : > { %s1179_s26 = smov (%p32_p0, %s31_s26), 0  ;;  %p166_p5 = scmp.eq.s32.totalorder %s713_s25, 3 }
   0xd   : > { %p1042_p4 = por %p160_p2, %p159_p1  ;;  %s144_s29 = ssub.s32 %s950_s22, %s1179_s26 }
   0xe   : > { %p717_p6 = scmp.ge.s32.totalorder %s954_s23, 1  ;;  %p147_p7 = scmp.eq.s32.totalorder %s144_s29, 0 }
   0xf   : > { %p1049_p8 = por %p166_p5, %p165_p3  ;;  %p244_p9 = scmp.lt.s32.totalorder %s954_s23, 5 }
  0x10   : > { %s1055_s6 = scalar_select %p147_p7, %s942_s20, %s149_s27  }
  0x11   : > { %p245_p10 = pnand %p717_p6, %p244_p9 }
  0x12   : > { %p292_p11 = scmp.lt.s32.totalorder (!%p245_p10), %s946_s21, 3  ;;  %s1172_s0 = sld [smem:[#allocation8_spill]] (!%p245_p10) }
  0x13   : > { %248 = sbr.rel (%p245_p10) target bundleno = 587 (0x24b), region = 36  ;;  %s1107_s9 = sand.u32 (!%p245_p10), 1, %s938_s19  }
  0x14   : > { %s718_s10 = sshll.u32 (!%p245_p10), %s1107_s9, 3  ;;  %s537_s16 = scalar_lea.sflag (!%p245_p10), [#allocation5], %s1107_s9 }
  0x18   : > { %v956_v0 = vmov 2   ;;  %v957_v1 = vmov 0   ;;  %s1059_s7 = scalar_select %p292_p11, %s946_s21, 3  ;;  %v958_v2 = vmov 4   ;;  %v959_v4 = vmov 3   ;;  %v316_v18 = vld [vmem:[%s1166_s3] sm:$0xff]  }
  0x19   : > { %825 = vset.pattern.permute.xlu1 %v956_v0  ;;  %823 = vset.pattern.permute.xlu0 %v957_v1  ;;  %v960_v5 = vmov 1   ;;  %v961_v6 = vmov 5   ;;  %v962_v7 = vmov 6   ;;  %v963_v8 = vmov 8   ;;  %v725_v24 = vld [vmem:[%s1166_s3 + $0x8] sm:$0xff]   ;;  %v727_v31 = vld [vmem:[%s1166_s3 + $0x10] sm:$0xff]  }
  0x1a   : > { %827 = vset.pattern.permute.xlu2 %v958_v2  ;;  %s722_s8 = sshll.u32 %s1059_s7, 3  ;;  %v964_v9 = vmov 7   ;;  %v965_v10 = vmov 9   ;;  %v966_v11 = vmov 13   ;;  %v967_v12 = vmov 10   ;;  %s746_s12 = sshll.u32 %s1059_s7, 4 }
  0x1b   : > { %s303_s11 = scalar_lea.vmem %s1164_s1, %s722_s8  ;;  %v968_v13 = vmov 11   ;;  %v969_v14 = vmov 15   ;;  %v970_v15 = vmov 12   ;;  %v971_v16 = vmov 14   ;;  %s1071_s15 = scalar_lea.vmem %s1172_s0, %s746_s12  ;;  %v729_v39 = vld [vmem:[%s1166_s3 + $0x18] sm:$0xff]   ;;  %v731_v60 = vld [vmem:[%s1166_s3 + $0x20] sm:$0xff]  }
  0x1c   : > { %v315_v3 = vld [vmem:[%s303_s11] sm:$0xff]  ;;  %v317_v21 = vunpack.c.l.bf16 %v316_v18  ;;  %v329_v25 = vunpack.c.h.bf16 %v316_v18  ;;  %v340_v28 = vunpack.c.l.bf16 %v725_v24  ;;  %v351_v32 = vunpack.c.h.bf16 %v725_v24  ;;  %v314_v61 = vld [vmem:[%s1071_s15 + $0x8] sm:$0xff]  ;;  %s307_s29 = scalar_lea.vmem %s1165_s2, %s722_s8  ;;  %s291_s7 = scalar_lea.vmem [#allocation4], %s718_s10 }
  0x1d   : > { %344 = vperm.xlu1 %825, %v315_v3   ;;  %322 = vperm.xlu0 %823, %v315_v3   ;;  %v313_v19 = vld [vmem:[%s1071_s15] sm:$0xff]  ;;  %v362_v37 = vunpack.c.l.bf16 %v727_v31  ;;  %v373_v44 = vunpack.c.h.bf16 %v727_v31  ;;  %v384_v46 = vunpack.c.l.bf16 %v729_v39  ;;  %v395_v56 = vunpack.c.h.bf16 %v729_v39  ;;  %s742_s8 = sshll.u32 %s946_s21, 3  ;;  %s565_s14 = sshll.u32 %s291_s7, 4  ;;  %s566_s14 = int_to_ptr.vmem [resolvable:$true] %s565_s14 }
  0x1e   : > { %366 = vperm.xlu2 %827, %v315_v3   ;;  %v318_v23 = vperm.slane %v313_v19, 0  ;;  %v330_v26 = vperm.slane %v313_v19, 1  ;;  %v341_v29 = vperm.slane %v313_v19, 2  ;;  %v352_v33 = vperm.slane %v313_v19, 3  ;;  %s563_s13 = scalar_lea.hbm %s1168_s5, %s742_s8  ;;  %s864_s21 = scalar_lea.hbm %s1168_s5, 32 }
  0x1f   : > { %v363_v38 = vperm.slane %v313_v19, 4  ;;  %v374_v45 = vperm.slane %v313_v19, 5  ;;  %v385_v47 = vperm.slane %v313_v19, 6  ;;  %v396_v57 = vperm.slane %v313_v19, 7  ;;  %s567_s15 = sshll.u32 %s563_s13, 4  ;;  %s568_s15 = int_to_ptr.hbm [resolvable:$true] %s567_s15 }
  0x20   : > { %v319_v30 = vmul.f32 %v318_v23, %v317_v21  ;;  %v331_v34 = vmul.f32 %v330_v26, %v329_v25  ;;  %v342_v35 = vmul.f32 %v341_v29, %v340_v28  ;;  %v353_v42 = vmul.f32 %v352_v33, %v351_v32  ;;  %s858_s17 = sshra.s32 %s568_s15, 4  ;;  %s859_s17 = int_to_ptr.hbm [resolvable:$true] %s858_s17 }
  0x21   : > { %v364_v49 = vmul.f32 %v363_v38, %v362_v37  ;;  %v375_v54 = vmul.f32 %v374_v45, %v373_v44  ;;  %v386_v55 = vmul.f32 %v385_v47, %v384_v46  ;;  %v397_v2 = vmul.f32 %v396_v57, %v395_v56  ;;  %s860_s24 = scalar_lea.hbm %s859_s17, 8  ;;  %p865_p1 = scmp.lt.s32.totalorder %s859_s17, %s1168_s5 }
  0x22   : > { %v451_v26 = vperm.slane %v314_v61, 4  ;;  %v462_v33 = vperm.slane %v314_v61, 5  ;;  %v484_v44 = vperm.slane %v314_v61, 7  ;;  %vm493_vm0 = vcmask 64512   ;;  %p861_p12 = scmp.ne.s32.totalorder %s859_s17, %s860_s24  ;;  %p866_p2 = scmp.lt.s32.totalorder %s864_s21, %s860_s24 }
  0x23   : > { %vm512_vm1 = vcmask 1043456  }
  0x24   : > { %p862_p13 = pnand %p861_p12, %p1042_p4  ;;  %p867_p3 = por %p866_p2, %p865_p1 }
  0x25   : > { %826 = vset.pattern.permute.xlu1 %v959_v4  ;;  %824 = vset.pattern.permute.xlu0 %v960_v5  ;;  %v407_v4 = vperm.slane %v314_v61, 0 }
  0x26   : > { %355 = vperm.xlu1 %826, %v315_v3   ;;  %333 = vperm.xlu0 %824, %v315_v3   ;;  %p863_p0 = pneg %p862_p13 }
  0x27   : > { %828 = vset.pattern.permute.xlu2 %v961_v6  ;;  %v417_v6 = vunpack.c.h.bf16 %v731_v60 }
  0x28   : > { %377 = vperm.xlu2 %828, %v315_v3   ;;  %p868_p5 = pnand %p867_p3, %p863_p0 }
  0x2e   : > { %829 = vset.pattern.permute.xlu1 %v962_v7  ;;  %831 = vset.pattern.permute.xlu0 %v963_v8  ;;  %v418_v7 = vperm.slane %v314_v61, 1  ;;  %v733_v8 = vld [vmem:[%s1166_s3 + $0x28] sm:$0xff]  }
  0x2f   : > { %388 = vperm.xlu1 %829, %v315_v3   ;;  %410 = vperm.xlu0 %831, %v315_v3   ;;  %v439_v21 = vunpack.c.h.bf16 %v733_v8 }
  0x30   : > { %830 = vset.pattern.permute.xlu2 %v964_v9 }
  0x31   : > { %399 = vperm.xlu2 %830, %v315_v3  }
  0x37   : > { %832 = vset.pattern.permute.xlu1 %v965_v10  ;;  %836 = vset.pattern.permute.xlu0 %v966_v11 }
  0x38   : > { %421 = vperm.xlu1 %832, %v315_v3   ;;  %465 = vperm.xlu0 %836, %v315_v3  }
  0x39   : > { %833 = vset.pattern.permute.xlu2 %v967_v12 }
  0x3a   : > { %432 = vperm.xlu2 %833, %v315_v3  }
  0x40   : > { %834 = vset.pattern.permute.xlu1 %v968_v13  ;;  %839 = vset.pattern.permute.xlu0 %v969_v14 }
  0x41   : > { %443 = vperm.xlu1 %834, %v315_v3  }
  0x42   : > { %835 = vset.pattern.permute.xlu2 %v970_v15  ;;  %v428_v15 = vunpack.c.l.bf16 %v733_v8 }
  0x43   : > { %454 = vperm.xlu2 %835, %v315_v3  }
  0x49   : > { %837 = vset.pattern.permute.xlu1 %v971_v16  ;;  %v429_v16 = vperm.slane %v314_v61, 2 }
  0x4a   : > { %476 = vperm.xlu1 %837, %v315_v3  }
  0x4b   : > { %838 = vset.pattern.permute.xlu2 %v969_v14  ;;  %v419_v14 = vmul.f32 %v418_v7, %v417_v6  ;;  %v430_v24 = vmul.f32 %v429_v16, %v428_v15 }
  0x4c   : > { %487 = vperm.xlu2 %838, %v315_v3   ;;  %v406_v3 = vunpack.c.l.bf16 %v731_v60 }
  0x4e   : > { %v408_v11 = vmul.f32 %v407_v4, %v406_v3 }
  0x78   : > { %v367_v17 = vpop.permute.xlu2 %366 }
  0x79   : > { %v369_v58 = vmul.f32 %v367_v17, %v364_v49 }
  0x82   : > { %v378_v27 = vpop.permute.xlu2 %377 }
  0x83   : > { %v380_v63 = vmul.f32 %v378_v27, %v375_v54 }
  0x8b   : > { %v400_v51 = vpop.permute.xlu2 %399 }
  0x8c   : > { %v402_v10 = vmul.f32 %v400_v51, %v397_v2 }
  0x8f   : > { %v345_v20 = vpop.permute.xlu1 %344  ;;  %v323_v22 = vpop.permute.xlu0 %322 }
  0x90   : > { %v325_v36 = vmul.f32 %v323_v22, %v319_v30  ;;  %v347_v48 = vmul.f32 %v345_v20, %v342_v35  ;;  %v735_v20 = vld [vmem:[%s1166_s3 + $0x30] sm:$0xff]   ;;  %v440_v22 = vperm.slane %v314_v61, 3  ;;  %v737_v35 = vld [vmem:[%s1166_s3 + $0x38] sm:$0xff]  }
  0x91   : > { %v450_v25 = vunpack.c.l.bf16 %v735_v20  ;;  %v461_v32 = vunpack.c.h.bf16 %v735_v20 }
  0x92   : > { %v441_v28 = vmul.f32 %v440_v22, %v439_v21 }
  0x93   : > { %v463_v39 = vmul.f32 %v462_v33, %v461_v32 }
  0x94   : > { %v433_v12 = vpop.permute.xlu2 %432 }
  0x95   : > { %v435_v30 = vmul.f32 %v433_v12, %v430_v24 }
  0x98   : > { %v356_v40 = vpop.permute.xlu1 %355  ;;  %v334_v41 = vpop.permute.xlu0 %333 }
  0x99   : > { %v336_v43 = vmul.f32 %v334_v41, %v331_v34  ;;  %v358_v52 = vmul.f32 %v356_v40, %v353_v42  ;;  %v452_v34 = vmul.f32 %v451_v26, %v450_v25  ;;  %v472_v40 = vunpack.c.l.bf16 %v737_v35 }
  0x9a   : > { %v473_v42 = vperm.slane %v314_v61, 6 }
  0x9b   : > { %v337_v50 = vadd.f32 %v336_v43, %v325_v36  ;;  %v483_v43 = vunpack.c.h.bf16 %v737_v35 }
  0x9c   : > { %v474_v49 = vmul.f32 %v473_v42, %v472_v40 }
  0x9d   : > { %v348_v53 = vadd.f32 %v347_v48, %v337_v50  ;;  %v455_v31 = vpop.permute.xlu2 %454  ;;  %v485_v50 = vmul.f32 %v484_v44, %v483_v43 }
  0x9e   : > { %v457_v41 = vmul.f32 %v455_v31, %v452_v34 }
  0x9f   : > { %v359_v59 = vadd.f32 %v358_v52, %v348_v53 }
  0xa1   : > { %v370_v62 = vadd.f32 %v369_v58, %v359_v59  ;;  %v389_v0 = vpop.permute.xlu1 %388  ;;  %v411_v13 = vpop.permute.xlu0 %410 }
  0xa2   : > { %v391_v1 = vmul.f32 %v389_v0, %v386_v55  ;;  %v413_v18 = vmul.f32 %v411_v13, %v408_v11 }
  0xa3   : > { %v381_v5 = vadd.f32 %v380_v63, %v370_v62 }
  0xa5   : > { %v392_v9 = vadd.f32 %v391_v1, %v381_v5  ;;  %v507_v1 = vld [vmem:[%s307_s29] sm:$0xff] }
  0xa6   : > { %v488_v51 = vpop.permute.xlu2 %487  ;;  %v508_v2 = vpack.c.bf16 %v507_v1, %v507_v1 }
  0xa7   : > { %v403_v17 = vadd.f32 %v402_v10, %v392_v9  ;;  %v490_v55 = vmul.f32 %v488_v51, %v485_v50 }
  0xa8   : > { %v514_v3 = vsel %vm512_vm1, %v508_v2, 0 }
  0xa9   : > { %v414_v27 = vadd.f32 %v413_v18, %v403_v17  ;;  %523 = vmatpush.bf16.msra.mxu0 %v514_v3 }
  0xaa   : > { %v422_v19 = vpop.permute.xlu1 %421  ;;  %v466_v46 = vpop.permute.xlu0 %465 }
  0xab   : > { %v424_v23 = vmul.f32 %v422_v19, %v419_v14  ;;  %v468_v48 = vmul.f32 %v466_v46, %v463_v39 }
  0xad   : > { %v425_v29 = vadd.f32 %v424_v23, %v414_v27 }
  0xaf   : > { %v436_v37 = vadd.f32 %v435_v30, %v425_v29 }
  0xb3   : > { %v444_v36 = vpop.permute.xlu1 %443 }
  0xb4   : > { %v446_v38 = vmul.f32 %v444_v36, %v441_v28 }
  0xb6   : > { %v447_v45 = vadd.f32 %v446_v38, %v436_v37 }
  0xb8   : > { %v458_v47 = vadd.f32 %v457_v41, %v447_v45 }
  0xba   : > { %v469_v53 = vadd.f32 %v468_v48, %v458_v47 }
  0xbc   : > { %v477_v52 = vpop.permute.xlu1 %476 }
  0xbd   : > { %v479_v54 = vmul.f32 %v477_v52, %v474_v49 }
  0xbf   : > { %v480_v56 = vadd.f32 %v479_v54, %v469_v53 }
  0xc1   : > { %v491_v57 = vadd.f32 %v490_v55, %v480_v56 }
  0xc3   : > { %v492_v58 = vmul.f32 0.25, %v491_v57 }
  0xc5   : > { %v494_v59 = vsel %vm493_vm0, %v492_v58, -inf }
  0xc6   : > { %495 = vmax.xlane.f32.xlu1 %v494_v59 }
 0x139   : > { %v496_v60 = vpop.xlane.xlu1 %495 }
 0x13a   : > { %v497_v61 = vsub.f32 %v492_v58, %v496_v60 }
 0x13c   : > { %v498_v62 = vmul.f32 1.442695, %v497_v61 }
 0x13e   : > { %840 = vpow2.f32 %v498_v62 }
 0x144   : > { %v841_v63 = vpop.eup %840 }
 0x145   : > { %v500_v0 = vsel %vm493_vm0, %v841_v63, 0.0 }
 0x146   : > { %501 = vadd.xlane.f32.xlu2 %v500_v0 }
 0x1b9   : > { %v502_v4 = vpop.xlane.xlu2 %501 }
 0x1ba   : > { %842 = vrcp.f32 %v502_v4 }
 0x1c0   : > { %v843_v5 = vpop.eup %842 }
 0x1c1   : > { %v504_v6 = vmul.f32 %v843_v5, %v841_v63 }
 0x1c3   : > { %v506_v7 = vpack.c.bf16 %v504_v6, %v504_v6  ;;  %505 = vst.msk [vmem:[%s291_s7] sm:$0xff] %vm493_vm0, %v504_v6 }
 0x1c5   : > { %739 = vmatmul.msk.bf16.vlgmr.msra.gmra.mxu0 %vm493_vm0, %v506_v7 }
 0x1c6   : > { %871 = shalt.err (!%p868_p5)
}
 0x1c7   : > { %748 = dma.vmem_to_hbm [thread:$0]  (%p1042_p4), %s566_s14, 128, %s568_s15, %s537_s16   ;;  %vm529_vm2 = vcmask 130048  }
 0x1c8   : > { %s548_s12 = scalar_lea.hbm %s1167_s4, %s742_s8  ;;  %s284_s13 = scalar_lea.vmem [#allocation2], %s718_s10 }
 0x1c9   : > { %s550_s25 = sshll.u32 %s284_s13, 4  ;;  %s552_s27 = sshll.u32 %s548_s12, 4  ;;  %s551_s25 = int_to_ptr.vmem [resolvable:$true] %s550_s25  ;;  %s553_s27 = int_to_ptr.hbm [resolvable:$true] %s552_s27 }
 0x1ca   : > { %s532_s0 = scalar_lea.sflag [#allocation3], %s1107_s9  ;;  %s886_s17 = sshra.s32 %s553_s27, 4  ;;  %s887_s17 = int_to_ptr.hbm [resolvable:$true] %s886_s17 }
 0x1cb   : > { %s888_s24 = scalar_lea.hbm %s887_s17, 8  ;;  %s892_s8 = scalar_lea.hbm %s1167_s4, 32 }
 0x1cc   : > { %p889_p6 = scmp.ne.s32.totalorder %s887_s17, %s888_s24  ;;  %p893_p10 = scmp.lt.s32.totalorder %s887_s17, %s1167_s4 }
 0x1cd   : > { %p894_p11 = scmp.lt.s32.totalorder %s892_s8, %s888_s24 }
 0x1ce   : > { %p890_p7 = pnand %p889_p6, %p1042_p4 }
 0x1cf   : > { %p895_p12 = por %p894_p11, %p893_p10 }
 0x1d0   : > { %p891_p9 = pneg %p890_p7 }
 0x1d2   : > { %p896_p13 = pnand %p895_p12, %p891_p9 }
 0x242   : > { %v525_v8 = vpop.f32.mrf.mxu0 }
 0x243   : > { %530 = vst.msk [vmem:[%s284_s13] sm:$0xff] %vm529_vm2, %v525_v8 }
 0x244   : > { %899 = shalt.err (!%p896_p13)
}
 0x245   : > { %747 = dma.vmem_to_hbm [thread:$0]  (%p1042_p4), %s551_s25, 128, %s553_s27, %s532_s0  }
 0x24a   : > { %v527_v9 = vpop.f32.mrf.mxu0 }
 0x24b PF: > { %p758_p0 = scmp.ge.s32.totalorder %s954_s23, 2  ;;  %s579_s9 = sand.u32 1, %s934_s18  }
 0x24c   : > { %s580_s21 = scalar_lea.sflag [#allocation3], %s579_s9 }
 0x24d   : > { %p752_p1 = pnand %p758_p0, %p1049_p8 }
 0x24f   : > { %p753_p2 = pneg %p752_p1 }
 0x251   : > { %925 = dma.done.wait (%p753_p2), %s580_s21, 128  }
 0x252   : > { %927 = vsyncadd (%p753_p2), %s580_s21, 4294967168  ;;  %s590_s29 = scalar_lea.sflag [#allocation5], %s579_s9 }
 0x253   : > { %929 = dma.done.wait (%p753_p2), %s590_s29, 128  }
 0x254   : > { %931 = vsyncadd (%p753_p2), %s590_s29, 4294967168  ;;  %s22_s23 = sadd.s32 1, %s954_s23   ;;  %s1173_s18 = smov %s938_s19 }
 0x255   : > { %p19_p3 = scmp.ge.s32.totalorder %s22_s23, 6   ;;  %s1174_s19 = smov %s942_s20 }
 0x256   : > { %s1175_s20 = smov %s1055_s6  ;;  %s1176_s21 = smov %s950_s22 }
 0x257   : > { %s1177_s22 = smov %s1179_s26  ;;  %21 = sbr.rel (!%p19_p3) target bundleno = 8 (0x8), region = 112 }
 0x25c   :  { %596 = vsyncpa [#allocation3], 1 }
 0x25d   :  { %598 = vsyncpa [#allocation3 + $0x1], 1 }
 0x25e   :  { %599 = vsyncpa [#allocation5], 1 }
 0x25f   :  { %601 = vsyncpa [#allocation5 + $0x1], 1 }

</bundles_post_ra>
